<compile_context>
chip_gen: v5e
topology: v5e:2x2
jax: 0.10.0
libtpu: 0.0.40
codegen_flags: <defaults>
</compile_context>

<pallas_src>
import jax
import jax.numpy as jnp
from jax.experimental import pallas as pl
from jax.experimental.pallas import tpu as pltpu

_LANE = 128
_MAX_BLOCK_ROWS = 2048  # bounds the lane-padded (block_rows, 1) param buffers


def _round_up(x, m):
    return ((x + m - 1) // m) * m


def _round_down(x, m):
    return (x // m) * m


def _generation_budget():
    """Returns (target_block_bytes, scoped_vmem_cap_bytes) for this TPU gen."""
    try:
        vmem_phys = int(pltpu.get_tpu_info().vmem_capacity_bytes)
    except Exception:
        vmem_phys = 64 << 20  # conservative: assume v7x (64 MiB per TC)
    if vmem_phys >= (96 << 20):      # v5e / v6e: 128 MiB physical VMEM
        return 16 << 20, 96 << 20
    return 8 << 20, 44 << 20         # v7x: 64 MiB physical VMEM


def _norm_kernel(mean_ref, inv_std_ref, img_ref, out_ref):
    # mean_ref / inv_std_ref: (block_rows, 1) f32 -> broadcast across lanes.
    # img_ref / out_ref:      (block_rows, block_cols).
    x = img_ref[...].astype(jnp.float32)
    y = (x - mean_ref[...]) * inv_std_ref[...]
    out_ref[...] = y.astype(out_ref.dtype)


def normalization_forward(img, mean, std, *, xla_fusion_below_bytes=0):
    """img: (B, C, H, W); mean/std: (C,). Returns (img - mean[:,None,None]) / std."""
    B, C, H, W = img.shape
    rows, cols = B * C, H * W
    itemsize = jnp.dtype(img.dtype).itemsize
    total_bytes = rows * cols * itemsize

    mean_f32 = jnp.asarray(mean, jnp.float32).reshape(-1)
    std_f32 = jnp.asarray(std, jnp.float32).reshape(-1)

    # Optional: for tiny tensors inside a larger XLA graph, a plain broadcast
    # expression fuses with neighbors and skips the extra HBM round trip.
    if total_bytes < xla_fusion_below_bytes:
        m4 = mean_f32.reshape(1, C, 1, 1)
        s4 = std_f32.reshape(1, C, 1, 1)
        return ((img.astype(jnp.float32) - m4) / s4).astype(img.dtype)

    # Lane-dense 2D view (contiguous reshape, free in XLA).
    x2d = img.reshape(rows, cols)

    # Per-row (batch*channel) params; row index = b*C + c -> channel c.
    inv_std_f32 = 1.0 / std_f32
    mean_rows = jnp.tile(mean_f32, B).reshape(rows, 1)
    inv_std_rows = jnp.tile(inv_std_f32, B).reshape(rows, 1)

    # ---- Block sizing: cdiv-based, (8,128)-aligned, generation-aware. ----
    target_bytes, vmem_cap = _generation_budget()
    elems_budget = max(1, target_bytes // itemsize)
    # dtype-aware sublane unit: 8 for f32, 16 for bf16, 32 for int8/fp8.
    sublane = 8 * max(1, 4 // itemsize)

    # Lane axis: full extent when it fits; otherwise a 128-aligned cap
    # (ragged last block is masked by Pallas automatically).
    col_cap = max(_LANE, _round_down(elems_budget // sublane, _LANE))
    block_cols = cols if cols <= col_cap else col_cap

    row_budget = min(max(sublane, elems_budget // block_cols), _MAX_BLOCK_ROWS)
    if rows <= row_budget:
        block_rows = rows                                   # full extent
    else:
        block_rows = max(sublane, _round_down(row_budget, sublane))

    grid_r = pl.cdiv(rows, block_rows)
    grid_c = pl.cdiv(cols, block_cols)

    # Guarantee >=2 "parallel" blocks for mid/large tensors so the megacore
    # (v7x: 2 TCs) can shard the grid; no-op where only one block is possible.
    if grid_r * grid_c == 1 and total_bytes > (2 << 20):
        if rows >= 2 * sublane:
            block_rows = _round_up(pl.cdiv(rows, 2), sublane)
            grid_r = pl.cdiv(rows, block_rows)
        elif cols >= 2 * _LANE:
            block_cols = _round_up(pl.cdiv(cols, 2), _LANE)
            grid_c = pl.cdiv(cols, block_cols)

    # ---- VMEM budget: double-buffered img in+out blocks plus the lane-padded
    # (block_rows, 1) param blocks (each pads to block_rows x 128 lanes). ----
    img_block_bytes = block_rows * block_cols * itemsize
    param_block_bytes = _round_up(block_rows, 8) * _LANE * 4
    needed = 2 * 2 * img_block_bytes + 2 * 2 * param_block_bytes + (2 << 20)
    vmem_limit = int(min(max(needed, 16 << 20), vmem_cap))

    out2d = pl.pallas_call(
        _norm_kernel,
        out_shape=jax.ShapeDtypeStruct((rows, cols), img.dtype),
        grid=(grid_r, grid_c),
        in_specs=[
            pl.BlockSpec((block_rows, 1), lambda i, j: (i, 0)),           # mean
            pl.BlockSpec((block_rows, 1), lambda i, j: (i, 0)),           # 1/std
            pl.BlockSpec((block_rows, block_cols), lambda i, j: (i, j)),  # img
        ],
        out_specs=pl.BlockSpec((block_rows, block_cols), lambda i, j: (i, j)),
        compiler_params=pltpu.CompilerParams(
            dimension_semantics=("parallel", "parallel"),
            vmem_limit_bytes=vmem_limit,
        ),
    )(mean_rows, inv_std_rows, x2d)

    return out2d.reshape(B, C, H, W)


if __name__ == "__main__":
    key = jax.random.PRNGKey(0)

    # The module's ImageNet defaults (3 RGB channels).
    mean = jnp.array([0.485, 0.456, 0.406], dtype=jnp.float32)
    std = jnp.array([0.229, 0.224, 0.225], dtype=jnp.float32)

    # Small NCHW input consistent with the module.
    B, C, H, W = 2, 3, 16, 16
    img = jax.random.uniform(key, (B, C, H, W), dtype=jnp.float32)

    out = normalization_forward(img, mean, std)
    out = jax.block_until_ready(out)

    # Reference in plain JAX (same broadcasting as PyTorch's view(-1,1,1)).
    ref = (img - mean.reshape(-1, 1, 1)) / std.reshape(-1, 1, 1)
    assert out.shape == img.shape and out.dtype == img.dtype
    assert jnp.allclose(out, ref, rtol=1e-6, atol=1e-6)

    print("KERNEL_OK")
</pallas_src>

<mosaic_0001>
module attributes {stable_mosaic.version = 11 : i64} {
  func.func @_norm_kernel(%arg0: i32, %arg1: i32, %arg2: memref<6x1xf32, #tpu.memory_space<vmem>>, %arg3: memref<6x1xf32, #tpu.memory_space<vmem>>, %arg4: memref<6x256xf32, #tpu.memory_space<vmem>>, %arg5: memref<6x256xf32, #tpu.memory_space<vmem>>) attributes {dimension_semantics = [#tpu.dimension_semantics<parallel>, #tpu.dimension_semantics<parallel>], iteration_bounds = array<i64: 1, 1>, scalar_prefetch = 0 : i64, scratch_operands = 0 : i64, tpu.core_type = #tpu.core_type<tc>, window_params = [{transform_indices = @transform_0, window_bounds = array<i64: 6, 1>}, {transform_indices = @transform_1, window_bounds = array<i64: 6, 1>}, {transform_indices = @transform_2, window_bounds = array<i64: 6, 256>}, {transform_indices = @transform_3, window_bounds = array<i64: 6, 256>}]} {
    %c0 = arith.constant 0 : index
    %c0_0 = arith.constant 0 : index
    %0 = vector.load %arg4[%c0, %c0_0] : memref<6x256xf32, #tpu.memory_space<vmem>>, vector<6x256xf32>
    %c0_1 = arith.constant 0 : index
    %c0_2 = arith.constant 0 : index
    %1 = vector.load %arg2[%c0_1, %c0_2] : memref<6x1xf32, #tpu.memory_space<vmem>>, vector<6x1xf32>
    %2 = vector.broadcast %1 : vector<6x1xf32> to vector<6x256xf32>
    %3 = arith.subf %0, %2 : vector<6x256xf32>
    %c0_3 = arith.constant 0 : index
    %c0_4 = arith.constant 0 : index
    %4 = vector.load %arg3[%c0_3, %c0_4] : memref<6x1xf32, #tpu.memory_space<vmem>>, vector<6x1xf32>
    %5 = vector.broadcast %4 : vector<6x1xf32> to vector<6x256xf32>
    %6 = arith.mulf %3, %5 : vector<6x256xf32>
    %c0_5 = arith.constant 0 : index
    %c0_6 = arith.constant 0 : index
    %7 = vector.load %arg5[%c0_5, %c0_6] : memref<6x256xf32, #tpu.memory_space<vmem>>, vector<6x256xf32>
    tpu.vector_store %arg5[%c0_5, %c0_6], %6 {strides = array<i32>} : memref<6x256xf32, #tpu.memory_space<vmem>>, vector<6x256xf32>,
    return
  }
  func.func @transform_0(%arg0: i32, %arg1: i32) -> (i32, i32) {
    %c0_i32 = arith.constant 0 : i32
    %c0_i32_0 = arith.constant 0 : i32
    return %arg0, %c0_i32 : i32, i32
  }
  func.func @transform_1(%arg0: i32, %arg1: i32) -> (i32, i32) {
    %c0_i32 = arith.constant 0 : i32
    %c0_i32_0 = arith.constant 0 : i32
    return %arg0, %c0_i32 : i32, i32
  }
  func.func @transform_2(%arg0: i32, %arg1: i32) -> (i32, i32) {
    %c0_i32 = arith.constant 0 : i32
    return %arg0, %arg1 : i32, i32
  }
  func.func @transform_3(%arg0: i32, %arg1: i32) -> (i32, i32) {
    %c0_i32 = arith.constant 0 : i32
    return %arg0, %arg1 : i32, i32
  }
}

</mosaic_0001>

<bundles_post_ra>
// kernel: tpu_custom_call.1
= control target key start
LH: loop header
LB: loop body
LE: loop exit
PB: predicated region body
PF: predicated region fallthrough
CT: control target
= control target key end

     0   :  { %v80_v1 = vmov 0   ;;  %s117_s0 = inlined_call_operand.vmem [shape: f32[6,1], index: 0, kind: input, shape index: {}]   ;;  %s118_s1 = inlined_call_operand.vmem [shape: f32[6,1], index: 1, kind: input, shape index: {}]   ;;  %s119_s2 = inlined_call_operand.vmem [shape: f32[6,256], index: 2, kind: input, shape index: {}]   ;;  %s120_s3 = inlined_call_operand.hbm [shape: f32[6,256], index: 3, kind: output, shape index: {}]  }
   0x1   :  { %v17_v0 = vld [vmem:[%s117_s0] sm:$0x3f]  ;;  %53 = vset.pattern.permute.xlu0 %v80_v1 }
   0x2   :  { %8 = vsyncpa [#allocation3], 0  ;;  %20 = vperm.xlu0 %53, %v17_v0   ;;  %v25_v2 = vld [vmem:[%s118_s1] sm:$0x3f]  ;;  %v16_v5 = vld [vmem:[%s119_s2 + $0x8] sm:$0x3f] }
   0x3   :  { %v15_v4 = vld [vmem:[%s119_s2] sm:$0x3f]  ;;  %s81_s0 = smov [#allocation2]   ;;  %s42_s23 = sshll.u32 %s120_s3, 4  ;;  %s43_s23 = int_to_ptr.hbm [resolvable:$true] %s42_s23 }
   0x4   :  { %s40_s20 = sshll.u32 %s81_s0, 4  ;;  %s41_s20 = int_to_ptr.vmem [resolvable:$true] %s40_s20 }
   0xa   :  { %28 = vperm.xlu0 %53, %v25_v2  }
  0x74   :  { %v21_v3 = vpop.permute.xlu0 %20 }
  0x75   :  { %v23_v6 = vsub.f32 %v15_v4, %v21_v3  ;;  %v24_v7 = vsub.f32 %v16_v5, %v21_v3 }
  0x7c   :  { %v29_v8 = vpop.permute.xlu0 %28 }
  0x7d   :  { %v31_v9 = vmul.f32 %v29_v8, %v23_v6  ;;  %v32_v10 = vmul.f32 %v29_v8, %v24_v7 }
  0x7f   :  { %33 = vst [vmem:[#allocation2] sm:$0x3f] %v31_v9 }
  0x80   :  { %34 = vst [vmem:[#allocation2 + $0x8] sm:$0x3f] %v32_v10 }
  0x81   :  { %45 = dma.vmem_to_hbm [thread:$0]  %s41_s20, 256, %s43_s23, [#allocation3]  }
  0x82   :  { %78 = dma.done.wait [#allocation3], 256  }
  0x83   :  { %79 = vsyncadd [#allocation3], 4294967040 }
  0x84   :  { %50 = vsyncpa [#allocation3], 1 }

</bundles_post_ra>
